<compile_context>
chip_gen: v7x
topology: tpu7x:2x2x1
jax: 0.10.0
libtpu: 0.0.40
codegen_flags: <defaults>
</compile_context>

<pallas_src>
import jax
import jax.numpy as jnp
from jax import lax
from jax.experimental import pallas as pl
from jax.experimental.pallas import tpu as pltpu


# -----------------------------------------------------------------------------
# Pallas kernel: batched token gather  (B, L, D) x (B, Lk) -> (B, Lk, D)
# -----------------------------------------------------------------------------
def _gather_tokens_kernel(ids_ref, x_ref, o_ref):
    # ids_ref: SMEM (scalar prefetch), flat (B*Lk,) int32 row indices.
    # x_ref  : VMEM, (L, D)  -- full source sequence of the current batch elem.
    # o_ref  : VMEM, (Lk, D) -- gathered rows for the current batch elem.
    b = pl.program_id(0)
    lk = o_ref.shape[0]
    base = b * lk

    def body(r, carry):
        row = ids_ref[base + r]
        o_ref[pl.ds(r, 1), :] = x_ref[pl.ds(row, 1), :]
        return carry

    # Short keep-lists fully unroll (LLO visibility); long ones unroll by 8.
    lax.fori_loop(0, lk, body, 0, unroll=True if lk <= 64 else 8)


def gather_tokens(x, ids_keep):
    """x: (B, L, D), ids_keep: (B, Lk) int -> (B, Lk, D) via Pallas gather."""
    B, L, D = x.shape
    _, Lk = ids_keep.shape
    # Clamp for safety: an out-of-range index would silently read wrong rows.
    ids = jnp.clip(ids_keep.astype(jnp.int32), 0, L - 1).reshape(-1)

    itemsize = jnp.dtype(x.dtype).itemsize
    # double-buffered (L, D) input + (Lk, D) output blocks, plus headroom
    vmem_bytes = int(2 * (L * D + Lk * D) * itemsize + (2 << 20))
    vmem_bytes = max(vmem_bytes, 32 << 20)

    cost = pl.CostEstimate(
        flops=0,
        transcendentals=0,
        bytes_accessed=int((B * L * D + B * Lk * D) * itemsize + ids.size * 4),
    )

    return pl.pallas_call(
        _gather_tokens_kernel,
        out_shape=jax.ShapeDtypeStruct((B, Lk, D), x.dtype),
        grid_spec=pltpu.PrefetchScalarGridSpec(
            num_scalar_prefetch=1,
            grid=(B,),
            # whole (L, D) sequence of batch element b resident in VMEM
            in_specs=[pl.BlockSpec((None, L, D), lambda b, ids_ref: (b, 0, 0))],
            out_specs=pl.BlockSpec((None, Lk, D), lambda b, ids_ref: (b, 0, 0)),
        ),
        compiler_params=pltpu.CompilerParams(
            dimension_semantics=("parallel",),
            vmem_limit_bytes=vmem_bytes),
        cost_estimate=cost,
    )(ids, x)


# -----------------------------------------------------------------------------
# MAE-style "remain" helpers (glue: noise, argsort, index bookkeeping).
# -----------------------------------------------------------------------------
def _random_remain_ids(key, B, L, remain_rto, bias=None):
    """Returns (ids_keep, ids_restore, len_keep)."""
    len_keep = max(1, int(L * remain_rto))
    noise = jax.random.uniform(key, (B, L), dtype=jnp.float32)
    if bias is not None:
        # push biased (e.g. padded) tokens to the end of the shuffle
        noise = noise + bias.astype(jnp.float32) * 10.0
    ids_shuffle = jnp.argsort(noise, axis=1).astype(jnp.int32)
    # ids_restore via scatter of iota (O(L)) instead of a second argsort.
    rows = jnp.arange(B, dtype=jnp.int32)[:, None]
    iota = jnp.broadcast_to(jnp.arange(L, dtype=jnp.int32)[None, :], (B, L))
    ids_restore = jnp.zeros((B, L), jnp.int32).at[rows, ids_shuffle].set(iota)
    ids_keep = ids_shuffle[:, :len_keep]
    return ids_keep, ids_restore, len_keep


def temporal_remain(data_dict, padding_mask_dict, remain_rto, temporal_cols, key):
    out, idx_dict, pmask_dict = {}, {}, {}
    if not temporal_cols:
        return out, idx_dict, pmask_dict
    # Fuse all same-shaped temporal columns into a single Pallas launch.
    groups = {}
    for col in temporal_cols:
        groups.setdefault(tuple(data_dict[col].shape), []).append(col)
    for shape, cols in groups.items():
        key, sub = jax.random.split(key)
        B, L, D = shape
        C = len(cols)
        x = jnp.concatenate([data_dict[c] for c in cols], axis=0)   # (C*B, L, D)
        ids_keep, ids_restore, len_keep = _random_remain_ids(
            sub, C * B, L, remain_rto)
        kept = gather_tokens(x, ids_keep)                           # one launch
        kept = kept.reshape(C, B, len_keep, D)
        ids_keep_c = ids_keep.reshape(C, B, len_keep)
        ids_restore_c = ids_restore.reshape(C, B, L)
        for ci, col in enumerate(cols):
            out[col] = kept[ci]
            idx_dict[f"{col}_remain_idx"] = ids_keep_c[ci]
            idx_dict[f"{col}_revert_idx"] = ids_restore_c[ci]
            pm = padding_mask_dict.get(f"{col}_padding_mask",
                                       jnp.zeros((B, L), jnp.float32))
            pmask_dict[f"{col}_remain_padding_mask"] = jnp.take_along_axis(
                pm, ids_keep_c[ci], axis=1)
    return out, idx_dict, pmask_dict


def img_remain(data_dict, remain_rto, img_cols, key, global_token):
    out, idx_dict, pmask_dict = {}, {}, {}
    for col in img_cols:
        key, sub = jax.random.split(key)
        x = data_dict[col]                       # (B, G + N, D), G global tokens
        B, L, D = x.shape
        G = global_token
        N = L - G
        glob = x[:, :G, :]
        patches = x[:, G:, :]
        ids_keep, ids_restore, len_keep = _random_remain_ids(sub, B, N, remain_rto)
        kept = gather_tokens(patches, ids_keep)  # Pallas gather
        out[col] = jnp.concatenate([glob, kept], axis=1)
        idx_dict[f"{col}_remain_idx"] = ids_keep
        idx_dict[f"{col}_revert_idx"] = ids_restore
        pmask_dict[f"{col}_remain_padding_mask"] = jnp.zeros(
            (B, G + len_keep), jnp.float32)
    return out, idx_dict, pmask_dict


def nlp_remain(data_dict, idx_dict, padding_mask_dict, remain_rto, nlp_cols, key):
    # TODO(synk): NlpRemain's exact output-dict layout is not in the provided
    # snippet; remain/revert indices are written into the (mutated) idx_dict,
    # padding masks into the returned padding-mask dict.
    out, pmask_dict = {}, {}
    for col in nlp_cols:
        key, sub = jax.random.split(key)
        x = data_dict[col]                       # (B, L, D)
        B, L, D = x.shape
        pm = padding_mask_dict.get(f"{col}_padding_mask",
                                   jnp.zeros((B, L), jnp.float32))
        ids_keep, ids_restore, _ = _random_remain_ids(sub, B, L, remain_rto,
                                                      bias=pm)
        out[col] = gather_tokens(x, ids_keep)    # Pallas gather
        idx_dict[f"{col}_remain_idx"] = ids_keep
        idx_dict[f"{col}_revert_idx"] = ids_restore
        pmask_dict[f"{col}_remain_padding_mask"] = jnp.take_along_axis(
            pm, ids_keep, axis=1)
    return out, pmask_dict


def remain_forward(data_dict, idx_dict, padding_mask_dict, remain_rto,
                   temporal_cols, img_cols, nlp_cols, key, global_token=1):
    """Mirrors Remain.forward (device arg replaced by a PRNG key)."""
    k_t, k_i, k_n = jax.random.split(key, 3)
    idx_dict = dict(idx_dict)
    padding_mask_dict = dict(padding_mask_dict)

    temporal_dict, t_idx, t_pm = temporal_remain(
        data_dict, padding_mask_dict, remain_rto["temporal"], temporal_cols, k_t)
    idx_dict.update(t_idx)
    padding_mask_dict.update(t_pm)

    img_dict, i_idx, i_pm = img_remain(
        data_dict, remain_rto["img"], img_cols, k_i, global_token)
    idx_dict.update(i_idx)
    padding_mask_dict.update(i_pm)

    nlp_dict, n_pm = nlp_remain(
        data_dict, idx_dict, padding_mask_dict, remain_rto["nlp"], nlp_cols, k_n)
    padding_mask_dict.update(n_pm)

    return temporal_dict, img_dict, nlp_dict, idx_dict, padding_mask_dict


# -----------------------------------------------------------------------------
# Demo / self-check
# -----------------------------------------------------------------------------
if __name__ == "__main__":
    key = jax.random.PRNGKey(0)
    B, D = 2, 128            # lane-dense hidden dim (multiple of 128)
    L_temporal = 16          # temporal sequence length
    N_img = 16               # image patch tokens (plus 1 global token)
    L_nlp = 8                # nlp tokens
    global_token = 1

    temporal_cols = ["price", "volume"]
    img_cols = ["chart"]
    nlp_cols = ["news"]

    k = iter(jax.random.split(key, 16))
    data_dict = {
        "price":  jax.random.normal(next(k), (B, L_temporal, D), jnp.float32),
        "volume": jax.random.normal(next(k), (B, L_temporal, D), jnp.float32),
        "chart":  jax.random.normal(next(k), (B, global_token + N_img, D),
                                    jnp.float32),
        "news":   jax.random.normal(next(k), (B, L_nlp, D), jnp.float32),
    }
    padding_mask_dict = {
        "price_padding_mask":  jnp.zeros((B, L_temporal), jnp.float32),
        "volume_padding_mask": jnp.zeros((B, L_temporal), jnp.float32),
        # last two nlp tokens of each sample are padding
        "news_padding_mask": jnp.concatenate(
            [jnp.zeros((B, L_nlp - 2), jnp.float32),
             jnp.ones((B, 2), jnp.float32)], axis=1),
    }
    idx_dict = {}
    remain_rto = {"temporal": 0.5, "img": 0.25, "nlp": 0.5}

    t_dict, i_dict, n_dict, out_idx, out_pm = remain_forward(
        data_dict, idx_dict, padding_mask_dict, remain_rto,
        temporal_cols, img_cols, nlp_cols, next(k), global_token)

    jax.block_until_ready((t_dict, i_dict, n_dict, out_idx, out_pm))

    # sanity: Pallas gather must match the pure-JAX gather
    for col in temporal_cols:
        ref = jnp.take_along_axis(
            data_dict[col], out_idx[f"{col}_remain_idx"][..., None], axis=1)
        assert jnp.array_equal(t_dict[col], ref), f"gather mismatch ({col})"
        assert t_dict[col].shape == (B, L_temporal // 2, D)

    chart_patches = data_dict["chart"][:, global_token:, :]
    ref_chart = jnp.take_along_axis(
        chart_patches, out_idx["chart_remain_idx"][..., None], axis=1)
    assert jnp.array_equal(i_dict["chart"][:, global_token:, :], ref_chart)
    assert jnp.array_equal(i_dict["chart"][:, :global_token, :],
                           data_dict["chart"][:, :global_token, :])
    assert i_dict["chart"].shape == (B, global_token + N_img // 4, D)

    ref_news = jnp.take_along_axis(
        data_dict["news"], out_idx["news_remain_idx"][..., None], axis=1)
    assert jnp.array_equal(n_dict["news"], ref_news)
    assert n_dict["news"].shape == (B, L_nlp // 2, D)

    # restore indices built by scatter must invert the shuffle on kept tokens
    for col, lk in (("price", L_temporal // 2), ("news", L_nlp // 2)):
        inv = jnp.take_along_axis(out_idx[f"{col}_revert_idx"],
                                  out_idx[f"{col}_remain_idx"], axis=1)
        assert jnp.array_equal(
            inv, jnp.broadcast_to(jnp.arange(lk, dtype=jnp.int32), (B, lk)))

    # padded nlp tokens must be dropped first -> kept padding mask all zero
    assert jnp.array_equal(out_pm["news_remain_padding_mask"],
                           jnp.zeros((B, L_nlp // 2), jnp.float32))

    print("KERNEL_OK")
</pallas_src>

<mosaic_0001>
module attributes {stable_mosaic.version = 11 : i64} {
  func.func @_gather_tokens_kernel(%arg0: i32, %arg1: memref<32xi32, #tpu.memory_space<smem>>, %arg2: memref<1x16x128xf32, #tpu.memory_space<vmem>>, %arg3: memref<1x8x128xf32, #tpu.memory_space<vmem>>) attributes {dimension_semantics = [#tpu.dimension_semantics<parallel>], iteration_bounds = array<i64: 4>, scalar_prefetch = 1 : i64, scratch_operands = 0 : i64, tpu.core_type = #tpu.core_type<tc>, window_params = [{transform_indices = @transform_0, window_bounds = array<i64: 1, 16, 128>}, {transform_indices = @transform_1, window_bounds = array<i64: 1, 8, 128>}]} {
    %c8_i32 = arith.constant 8 : i32
    %0 = arith.muli %arg0, %c8_i32 : i32
    %c0_i32 = arith.constant 0 : i32
    %1 = arith.addi %0, %c0_i32 : i32
    %2 = arith.index_cast %1 : i32 to index
    %3 = memref.load %arg1[%2] : memref<32xi32, #tpu.memory_space<smem>>
    %c0 = arith.constant 0 : index
    %4 = arith.index_cast %3 : i32 to index
    %c0_0 = arith.constant 0 : index
    %5 = vector.load %arg2[%c0, %4, %c0_0] : memref<1x16x128xf32, #tpu.memory_space<vmem>>, vector<1x1x128xf32>
    %6 = vector.shape_cast %5 : vector<1x1x128xf32> to vector<1x128xf32>
    %c0_1 = arith.constant 0 : index
    %7 = arith.index_cast %c0_i32 : i32 to index
    %c0_2 = arith.constant 0 : index
    %8 = vector.load %arg3[%c0_1, %7, %c0_2] : memref<1x8x128xf32, #tpu.memory_space<vmem>>, vector<1x1x128xf32>
    %9 = vector.shape_cast %8 : vector<1x1x128xf32> to vector<1x128xf32>
    %10 = vector.shape_cast %6 : vector<1x128xf32> to vector<1x1x128xf32>
    tpu.vector_store %arg3[%c0_1, %7, %c0_2], %10 {strides = array<i32>} : memref<1x8x128xf32, #tpu.memory_space<vmem>>, vector<1x1x128xf32>,
    %c1_i32 = arith.constant 1 : i32
    %11 = arith.addi %0, %c1_i32 : i32
    %12 = arith.index_cast %11 : i32 to index
    %13 = memref.load %arg1[%12] : memref<32xi32, #tpu.memory_space<smem>>
    %c0_3 = arith.constant 0 : index
    %14 = arith.index_cast %13 : i32 to index
    %c0_4 = arith.constant 0 : index
    %15 = vector.load %arg2[%c0_3, %14, %c0_4] : memref<1x16x128xf32, #tpu.memory_space<vmem>>, vector<1x1x128xf32>
    %16 = vector.shape_cast %15 : vector<1x1x128xf32> to vector<1x128xf32>
    %c0_5 = arith.constant 0 : index
    %17 = arith.index_cast %c1_i32 : i32 to index
    %c0_6 = arith.constant 0 : index
    %18 = vector.load %arg3[%c0_5, %17, %c0_6] : memref<1x8x128xf32, #tpu.memory_space<vmem>>, vector<1x1x128xf32>
    %19 = vector.shape_cast %18 : vector<1x1x128xf32> to vector<1x128xf32>
    %20 = vector.shape_cast %16 : vector<1x128xf32> to vector<1x1x128xf32>
    tpu.vector_store %arg3[%c0_5, %17, %c0_6], %20 {strides = array<i32>} : memref<1x8x128xf32, #tpu.memory_space<vmem>>, vector<1x1x128xf32>,
    %c2_i32 = arith.constant 2 : i32
    %21 = arith.addi %0, %c2_i32 : i32
    %22 = arith.index_cast %21 : i32 to index
    %23 = memref.load %arg1[%22] : memref<32xi32, #tpu.memory_space<smem>>
    %c0_7 = arith.constant 0 : index
    %24 = arith.index_cast %23 : i32 to index
    %c0_8 = arith.constant 0 : index
    %25 = vector.load %arg2[%c0_7, %24, %c0_8] : memref<1x16x128xf32, #tpu.memory_space<vmem>>, vector<1x1x128xf32>
    %26 = vector.shape_cast %25 : vector<1x1x128xf32> to vector<1x128xf32>
    %c0_9 = arith.constant 0 : index
    %27 = arith.index_cast %c2_i32 : i32 to index
    %c0_10 = arith.constant 0 : index
    %28 = vector.load %arg3[%c0_9, %27, %c0_10] : memref<1x8x128xf32, #tpu.memory_space<vmem>>, vector<1x1x128xf32>
    %29 = vector.shape_cast %28 : vector<1x1x128xf32> to vector<1x128xf32>
    %30 = vector.shape_cast %26 : vector<1x128xf32> to vector<1x1x128xf32>
    tpu.vector_store %arg3[%c0_9, %27, %c0_10], %30 {strides = array<i32>} : memref<1x8x128xf32, #tpu.memory_space<vmem>>, vector<1x1x128xf32>,
    %c3_i32 = arith.constant 3 : i32
    %31 = arith.addi %0, %c3_i32 : i32
    %32 = arith.index_cast %31 : i32 to index
    %33 = memref.load %arg1[%32] : memref<32xi32, #tpu.memory_space<smem>>
    %c0_11 = arith.constant 0 : index
    %34 = arith.index_cast %33 : i32 to index
    %c0_12 = arith.constant 0 : index
    %35 = vector.load %arg2[%c0_11, %34, %c0_12] : memref<1x16x128xf32, #tpu.memory_space<vmem>>, vector<1x1x128xf32>
    %36 = vector.shape_cast %35 : vector<1x1x128xf32> to vector<1x128xf32>
    %c0_13 = arith.constant 0 : index
    %37 = arith.index_cast %c3_i32 : i32 to index
    %c0_14 = arith.constant 0 : index
    %38 = vector.load %arg3[%c0_13, %37, %c0_14] : memref<1x8x128xf32, #tpu.memory_space<vmem>>, vector<1x1x128xf32>
    %39 = vector.shape_cast %38 : vector<1x1x128xf32> to vector<1x128xf32>
    %40 = vector.shape_cast %36 : vector<1x128xf32> to vector<1x1x128xf32>
    tpu.vector_store %arg3[%c0_13, %37, %c0_14], %40 {strides = array<i32>} : memref<1x8x128xf32, #tpu.memory_space<vmem>>, vector<1x1x128xf32>,
    %c4_i32 = arith.constant 4 : i32
    %41 = arith.addi %0, %c4_i32 : i32
    %42 = arith.index_cast %41 : i32 to index
    %43 = memref.load %arg1[%42] : memref<32xi32, #tpu.memory_space<smem>>
    %c0_15 = arith.constant 0 : index
    %44 = arith.index_cast %43 : i32 to index
    %c0_16 = arith.constant 0 : index
    %45 = vector.load %arg2[%c0_15, %44, %c0_16] : memref<1x16x128xf32, #tpu.memory_space<vmem>>, vector<1x1x128xf32>
    %46 = vector.shape_cast %45 : vector<1x1x128xf32> to vector<1x128xf32>
    %c0_17 = arith.constant 0 : index
    %47 = arith.index_cast %c4_i32 : i32 to index
    %c0_18 = arith.constant 0 : index
    %48 = vector.load %arg3[%c0_17, %47, %c0_18] : memref<1x8x128xf32, #tpu.memory_space<vmem>>, vector<1x1x128xf32>
    %49 = vector.shape_cast %48 : vector<1x1x128xf32> to vector<1x128xf32>
    %50 = vector.shape_cast %46 : vector<1x128xf32> to vector<1x1x128xf32>
    tpu.vector_store %arg3[%c0_17, %47, %c0_18], %50 {strides = array<i32>} : memref<1x8x128xf32, #tpu.memory_space<vmem>>, vector<1x1x128xf32>,
    %c5_i32 = arith.constant 5 : i32
    %51 = arith.addi %0, %c5_i32 : i32
    %52 = arith.index_cast %51 : i32 to index
    %53 = memref.load %arg1[%52] : memref<32xi32, #tpu.memory_space<smem>>
    %c0_19 = arith.constant 0 : index
    %54 = arith.index_cast %53 : i32 to index
    %c0_20 = arith.constant 0 : index
    %55 = vector.load %arg2[%c0_19, %54, %c0_20] : memref<1x16x128xf32, #tpu.memory_space<vmem>>, vector<1x1x128xf32>
    %56 = vector.shape_cast %55 : vector<1x1x128xf32> to vector<1x128xf32>
    %c0_21 = arith.constant 0 : index
    %57 = arith.index_cast %c5_i32 : i32 to index
    %c0_22 = arith.constant 0 : index
    %58 = vector.load %arg3[%c0_21, %57, %c0_22] : memref<1x8x128xf32, #tpu.memory_space<vmem>>, vector<1x1x128xf32>
    %59 = vector.shape_cast %58 : vector<1x1x128xf32> to vector<1x128xf32>
    %60 = vector.shape_cast %56 : vector<1x128xf32> to vector<1x1x128xf32>
    tpu.vector_store %arg3[%c0_21, %57, %c0_22], %60 {strides = array<i32>} : memref<1x8x128xf32, #tpu.memory_space<vmem>>, vector<1x1x128xf32>,
    %c6_i32 = arith.constant 6 : i32
    %61 = arith.addi %0, %c6_i32 : i32
    %62 = arith.index_cast %61 : i32 to index
    %63 = memref.load %arg1[%62] : memref<32xi32, #tpu.memory_space<smem>>
    %c0_23 = arith.constant 0 : index
    %64 = arith.index_cast %63 : i32 to index
    %c0_24 = arith.constant 0 : index
    %65 = vector.load %arg2[%c0_23, %64, %c0_24] : memref<1x16x128xf32, #tpu.memory_space<vmem>>, vector<1x1x128xf32>
    %66 = vector.shape_cast %65 : vector<1x1x128xf32> to vector<1x128xf32>
    %c0_25 = arith.constant 0 : index
    %67 = arith.index_cast %c6_i32 : i32 to index
    %c0_26 = arith.constant 0 : index
    %68 = vector.load %arg3[%c0_25, %67, %c0_26] : memref<1x8x128xf32, #tpu.memory_space<vmem>>, vector<1x1x128xf32>
    %69 = vector.shape_cast %68 : vector<1x1x128xf32> to vector<1x128xf32>
    %70 = vector.shape_cast %66 : vector<1x128xf32> to vector<1x1x128xf32>
    tpu.vector_store %arg3[%c0_25, %67, %c0_26], %70 {strides = array<i32>} : memref<1x8x128xf32, #tpu.memory_space<vmem>>, vector<1x1x128xf32>,
    %c7_i32 = arith.constant 7 : i32
    %71 = arith.addi %0, %c7_i32 : i32
    %72 = arith.index_cast %71 : i32 to index
    %73 = memref.load %arg1[%72] : memref<32xi32, #tpu.memory_space<smem>>
    %c0_27 = arith.constant 0 : index
    %74 = arith.index_cast %73 : i32 to index
    %c0_28 = arith.constant 0 : index
    %75 = vector.load %arg2[%c0_27, %74, %c0_28] : memref<1x16x128xf32, #tpu.memory_space<vmem>>, vector<1x1x128xf32>
    %76 = vector.shape_cast %75 : vector<1x1x128xf32> to vector<1x128xf32>
    %c0_29 = arith.constant 0 : index
    %77 = arith.index_cast %c7_i32 : i32 to index
    %c0_30 = arith.constant 0 : index
    %78 = vector.load %arg3[%c0_29, %77, %c0_30] : memref<1x8x128xf32, #tpu.memory_space<vmem>>, vector<1x1x128xf32>
    %79 = vector.shape_cast %78 : vector<1x1x128xf32> to vector<1x128xf32>
    %80 = vector.shape_cast %76 : vector<1x128xf32> to vector<1x1x128xf32>
    tpu.vector_store %arg3[%c0_29, %77, %c0_30], %80 {strides = array<i32>} : memref<1x8x128xf32, #tpu.memory_space<vmem>>, vector<1x1x128xf32>,
    %c8_i32_31 = arith.constant 8 : i32
    return
  }
  func.func @transform_0(%arg0: i32, %arg1: memref<32xi32, #tpu.memory_space<smem>>) -> (i32, i32, i32) {
    %c0_i32 = arith.constant 0 : i32
    %c0_i32_0 = arith.constant 0 : i32
    %c0_i32_1 = arith.constant 0 : i32
    return %arg0, %c0_i32, %c0_i32_0 : i32, i32, i32
  }
  func.func @transform_1(%arg0: i32, %arg1: memref<32xi32, #tpu.memory_space<smem>>) -> (i32, i32, i32) {
    %c0_i32 = arith.constant 0 : i32
    %c0_i32_0 = arith.constant 0 : i32
    %c0_i32_1 = arith.constant 0 : i32
    return %arg0, %c0_i32, %c0_i32_0 : i32, i32, i32
  }
}

</mosaic_0001>

<bundles_post_ra>
// kernel: tpu_custom_call.1
= control target key start
LH: loop header
LB: loop body
LE: loop exit
PB: predicated region body
PF: predicated region fallthrough
CT: control target
= control target key end

     0   :  { %s648_s0 = inlined_call_operand.hbm [shape: s32[32], index: 0, kind: input, shape index: {}]   ;;  %s649_s1 = inlined_call_operand.hbm [shape: f32[4,16,128], index: 1, kind: input, shape index: {}]   ;;  %s650_s2 = inlined_call_operand.hbm [shape: f32[4,8,128], index: 2, kind: output, shape index: {}]  }
   0x1   :  { %652 = sst [smem:[#allocation11_spill]] %s649_s1  ;;  %s336_s11 = scalar_lea.hbm %s648_s0, 16 }
   0x2   :  { %p337_p0 = scmp.ne.s32.totalorder %s648_s0, %s336_s11  ;;  %p340_p1 = scmp.lt.u32.totalorder %s336_s11, %s648_s0 }
   0x4   :  { %p342_p2 = pnand %p340_p1, %p337_p0 }
   0x6   :  { %345 = shalt.err (!%p342_p2)  }
   0x7   :  { %s446_s16 = smov [#allocation3]  }
   0x8   :  { %8 = dma.hbm_to_smem %s648_s0, 16, %s446_s16, [#allocation2] }
   0x9   :  { %420 = dma.done.wait [#allocation2], 16 }
   0xa   :  { %421 = vsyncadd [#allocation2], 4294967280 }
   0xb   :  { %10 = sfence }
   0xc   :  { %11 = vsyncpa [#allocation5], 0 }
   0xd   :  { %13 = vsyncpa [#allocation5 + $0x1], 0 }
   0xe   :  { %14 = vsyncpa [#allocation6], 0 }
   0xf   :  { %16 = vsyncpa [#allocation6 + $0x1], 0  ;;  %s478_s19 = smov 0   ;;  %s480_s20 = smov 0  }
  0x10   :  { %s482_s21 = smov 0   ;;  %s484_s22 = smov 0  }
  0x11 LB: > { %s499_s0 = sadd.s32 4294967295, %s444_s22   ;;  %s272_s23 = sadd.s32 4294967294, %s444_s22   ;;  %s444_s22 = sphi %s484_s22, %s664_s22   ;;  %s440_s21 = sphi %s482_s21, %s663_s21   ;;  %s436_s20 = sphi %s480_s20, %s662_s20   ;;  %s432_s19 = sphi %s478_s19, %s661_s19  }
  0x12   : > { %s503_s24 = sadd.s32 1, %s444_s22   ;;  %s29_s25 = sadd.s32 1, %s440_s21 }
  0x13   : > { %s26_s26 = ssub.s32 %s444_s22, %s503_s24  ;;  %p36_p3 = scmp.ne.s32.totalorder %s440_s21, %s436_s20 }
  0x14   : > { %p27_p4 = scmp.eq.s32.totalorder %s26_s26, 0  ;;  %p37_p5 = scmp.eq.s32.totalorder %s444_s22, 0 }
  0x15   : > { %p42_p6 = scmp.ne.s32.totalorder %s436_s20, %s432_s19  ;;  %p43_p7 = scmp.eq.s32.totalorder %s499_s0, 0 }
  0x16   : > { %s515_s27 = scalar_select %p27_p4, %s440_s21, %s29_s25  }
  0x17   : > { %p517_p8 = por %p37_p5, %p36_p3  ;;  %p521_p9 = por %p43_p7, %p42_p6 }
  0x18   : > { %p66_p10 = scmp.eq.s32.totalorder %s499_s0, 3  ;;  %p72_p11 = scmp.eq.s32.totalorder %s272_s23, 3 }
  0x19   : > { %p299_p12 = scmp.lt.s32.totalorder %s444_s22, 4  ;;  %s92_s4 = sand.u32 1, %s440_s21  }
  0x1a   : > { %p527_p13 = por %p66_p10, %p36_p3  ;;  %p531_p0 = por %p72_p11, %p42_p6 }
  0x1b   : > { %s286_s5 = sshll.u32 %s444_s22, 8  ;;  %s275_s6 = sshll.u32 %s92_s4, 4 }
  0x1c   : > { %s655_s30 = scalar_select %p527_p13, 1, 0 }
  0x1d   : > { %s656_s3 = scalar_select %p531_p0, 1, 0 }
  0x1e   : > { %s657_s1 = sld [smem:[#allocation11_spill]]  ;;  %s96_s10 = scalar_lea.vmem [#allocation4], %s275_s6 }
  0x1f   : > { %s103_s11 = sshll.u32 %s96_s10, 4  ;;  %p544_p1 = pnand %p299_p12, %p517_p8  ;;  %s548_s11 = int_to_ptr.vmem [resolvable:$true] %s103_s11 }
  0x20   : > { %s550_s13 = scalar_lea.sflag [#allocation5], %s92_s4 }
  0x21   : > { %p348_p3 = pneg %p544_p1 }
  0x24   : > { %s540_s9 = scalar_lea.hbm %s657_s1, %s286_s5  ;;  %s351_s17 = scalar_lea.hbm %s657_s1, 1024 }
  0x25   : > { %s346_s14 = scalar_lea.hbm %s540_s9, 256  ;;  %p352_p6 = scmp.lt.u32.totalorder %s540_s9, %s657_s1 }
  0x26   : > { %p347_p2 = scmp.ne.s32.totalorder %s540_s9, %s346_s14  ;;  %p353_p7 = scmp.lt.u32.totalorder %s351_s17, %s346_s14 }
  0x27   : > { %p355_p10 = scmp.lt.u32.totalorder %s346_s14, %s540_s9 }
  0x28   : > { %p349_p4 = pnand %p348_p3, %p347_p2  ;;  %p354_p8 = por %p353_p7, %p352_p6 }
  0x2a   : > { %p350_p5 = pneg %p349_p4  ;;  %p356_p11 = por %p355_p10, %p354_p8 }
  0x2c   : > { %p357_p12 = pnand %p356_p11, %p350_p5 }
  0x2e   : > { %360 = shalt.err (!%p357_p12)
}
  0x2f   : > { %s361_s25 = scalar_lea.vmem %s548_s11, 256  ;;  %s447_s26 = smov [#allocation4]  }
  0x30   : > { %p362_p2 = scmp.ne.s32.totalorder %s548_s11, %s361_s25  ;;  %s366_s28 = sshll.u32 %s447_s26, 4  ;;  %s367_s28 = int_to_ptr.vmem [resolvable:$false] %s366_s28 }
  0x31   : > { %s368_s4 = scalar_lea.vmem %s367_s28, 512  ;;  %p369_p13 = scmp.lt.s32.totalorder %s548_s11, %s367_s28 }
  0x32   : > { %p364_p4 = pnand %p362_p2, %p348_p3  ;;  %p370_p6 = scmp.lt.s32.totalorder %s368_s4, %s361_s25 }
  0x34   : > { %p365_p0 = pneg %p364_p4  ;;  %p371_p7 = por %p370_p6, %p369_p13 }
  0x36   : > { %p372_p8 = pnand %p371_p7, %p365_p0 }
  0x38   : > { %375 = shalt.err (!%p372_p8)
}
  0x39   : > { %s448_s5 = smov 128   ;;  %s449_s6 = smov 8  }
  0x3a   : > { %294 = dma.hbm_to_vmem [thread:$0]  (!%p544_p1), %s540_s9, 256, %s548_s11, %s550_s13, %s448_s5, %s448_s5, %s449_s6  }
  0x3b   : > { %p278_p3 = scmp.ge.s32.totalorder %s444_s22, 1  ;;  %p111_p5 = scmp.lt.s32.totalorder %s444_s22, 5 }
  0x3d   : > { %p112_p10 = pnand %p278_p3, %p111_p5 }
  0x3e   : > { %s581_s7 = sand.u32 (!%p112_p10), 1, %s436_s20  }
  0x3f   : > { %115 = sbr.rel (%p112_p10) target bundleno = 109 (0x6d), region = 24  ;;  %s279_s8 = sshll.u32 (!%p112_p10), %s581_s7, 4 }
  0x40   : > { %s118_s10 = scalar_lea.sflag (!%p112_p10), [#allocation5], %s581_s7  ;;  %s585_s14 = scalar_lea.vmem (!%p112_p10), [#allocation4], %s279_s8 }
  0x46   : > { %423 = dma.done.wait (%p521_p9), %s118_s10, 256  }
  0x47   : > { %425 = vsyncadd (%p521_p9), %s118_s10, 4294967040  ;;  %s280_s9 = sshll.u32 %s581_s7, 3  ;;  %s281_s11 = sshll.u32 %s499_s0, 3 }
  0x48   : > { %s141_s12 = sld [smem:[#allocation3 + %s281_s11]]  ;;  %s145_s13 = sadd.s32 1, %s281_s11 }
  0x49   : > { %s150_s15 = sadd.s32 2, %s281_s11  ;;  %s146_s16 = sld [smem:[#allocation3 + %s145_s13]] }
  0x4a   : > { %s151_s17 = sld [smem:[#allocation3 + %s150_s15]]  ;;  %s155_s18 = sadd.s32 3, %s281_s11 }
  0x4b   : > { %s160_s23 = sadd.s32 4, %s281_s11  ;;  %s156_s25 = sld [smem:[#allocation3 + %s155_s18]] }
  0x4c   : > { %s161_s26 = sld [smem:[#allocation3 + %s160_s23]]  ;;  %s165_s28 = sadd.s32 5, %s281_s11 }
  0x4d   : > { %s170_s29 = sadd.s32 6, %s281_s11  ;;  %s166_s5 = sld [smem:[#allocation3 + %s165_s28]] }
  0x4e   : > { %s142_s4 = scalar_lea.vmem %s585_s14, %s141_s12 [#allocation4]  ;;  %s171_s6 = sld [smem:[#allocation3 + %s170_s29]] }
  0x4f   : > { %v143_v0 = vld [vmem:[%s142_s4] sm:$0x1]  ;;  %s175_s8 = sadd.s32 7, %s281_s11  ;;  %s139_s10 = scalar_lea.vmem [#allocation7], %s280_s9 }
  0x50   : > { %144 = vst [vmem:[%s139_s10] sm:$0x1] %v143_v0  ;;  %s147_s13 = scalar_lea.vmem %s585_s14, %s146_s16 [#allocation4]  ;;  %s152_s1 = scalar_lea.vmem %s585_s14, %s151_s17 [#allocation4] }
  0x51   : > { %v148_v1 = vld [vmem:[%s147_s13] sm:$0x1]  ;;  %s176_s15 = sld [smem:[#allocation3 + %s175_s8]]  ;;  %s157_s18 = scalar_lea.vmem %s585_s14, %s156_s25 [#allocation4] }
  0x52   : > { %v153_v2 = vld [vmem:[%s152_s1] sm:$0x1]  ;;  %149 = vst [vmem:[%s139_s10 + $0x1] sm:$0x1] %v148_v1  ;;  %s162_s23 = scalar_lea.vmem %s585_s14, %s161_s26 [#allocation4]  ;;  %s283_s12 = sshll.u32 %s499_s0, 7 }
  0x53   : > { %154 = vst [vmem:[%s139_s10 + $0x2] sm:$0x1] %v153_v2  ;;  %v158_v3 = vld [vmem:[%s157_s18] sm:$0x1]  ;;  %s167_s9 = scalar_lea.vmem %s585_s14, %s166_s5 [#allocation4]  ;;  %s194_s11 = sshll.u32 %s139_s10, 4  ;;  %s607_s11 = int_to_ptr.vmem [resolvable:$true] %s194_s11 }
  0x54   : > { %v163_v4 = vld [vmem:[%s162_s23] sm:$0x1]  ;;  %159 = vst [vmem:[%s139_s10 + $0x3] sm:$0x1] %v158_v3  ;;  %s172_s16 = scalar_lea.vmem %s585_s14, %s171_s6 [#allocation4]  ;;  %s604_s28 = scalar_lea.hbm %s650_s2, %s283_s12 }
  0x55   : > { %164 = vst [vmem:[%s139_s10 + $0x4] sm:$0x1] %v163_v4  ;;  %v168_v5 = vld [vmem:[%s167_s9] sm:$0x1]  ;;  %s181_s0 = scalar_lea.sflag [#allocation6], %s581_s7  ;;  %s376_s26 = scalar_lea.vmem %s607_s11, 128 }
  0x56   : > { %169 = vst [vmem:[%s139_s10 + $0x5] sm:$0x1] %v168_v5  ;;  %v173_v6 = vld [vmem:[%s172_s16] sm:$0x1]  ;;  %p377_p9 = scmp.ne.s32.totalorder %s607_s11, %s376_s26  ;;  %p659_p13 = scmp.ne.s32.totalorder %s655_s30, 0 }
  0x57   : > { %174 = vst [vmem:[%s139_s10 + $0x6] sm:$0x1] %v173_v6  ;;  %s177_s25 = scalar_lea.vmem %s585_s14, %s176_s15 [#allocation4]  ;;  %s450_s29 = smov [#allocation7]  }
  0x58   : > { %v178_v7 = vld [vmem:[%s177_s25] sm:$0x1]  ;;  %p378_p0 = pnand %p377_p9, %p659_p13  ;;  %s380_s4 = sshll.u32 %s450_s29, 4  ;;  %s381_s4 = int_to_ptr.vmem [resolvable:$false] %s380_s4 }
  0x59   : > { %179 = vst [vmem:[%s139_s10 + $0x7] sm:$0x1] %v178_v7  ;;  %s382_s5 = scalar_lea.vmem %s381_s4, 256  ;;  %p383_p11 = scmp.lt.s32.totalorder %s607_s11, %s381_s4 }
  0x5a   : > { %p379_p1 = pneg %p378_p0  ;;  %p384_p12 = scmp.lt.s32.totalorder %s382_s5, %s376_s26 }
  0x5c   : > { %p385_p2 = por %p384_p12, %p383_p11 }
  0x5e   : > { %p386_p4 = pnand %p385_p2, %p379_p1 }
  0x60   : > { %389 = shalt.err (!%p386_p4)
}
  0x61   : > { %s390_s7 = scalar_lea.hbm %s604_s28, 128  ;;  %s394_s8 = scalar_lea.hbm %s650_s2, 512 }
  0x62   : > { %p391_p6 = scmp.ne.s32.totalorder %s604_s28, %s390_s7  ;;  %p395_p3 = scmp.lt.u32.totalorder %s604_s28, %s650_s2 }
  0x63   : > { %p396_p5 = scmp.lt.u32.totalorder %s394_s8, %s390_s7  ;;  %p398_p9 = scmp.lt.u32.totalorder %s390_s7, %s604_s28 }
  0x64   : > { %p392_p7 = pnand %p391_p6, %p659_p13 }
  0x65   : > { %p397_p10 = por %p396_p5, %p395_p3 }
  0x66   : > { %p393_p8 = pneg %p392_p7 }
  0x67   : > { %p399_p0 = por %p398_p9, %p397_p10 }
  0x69   : > { %p400_p1 = pnand %p399_p0, %p393_p8 }
  0x6b   : > { %403 = shalt.err (!%p400_p1)
}
  0x6c   : > { %289 = dma.vmem_to_hbm [thread:$0]  (%p659_p13), %s607_s11, 128, %s604_s28, %s181_s0  }
  0x6d PF: > { %p300_p11 = scmp.ge.s32.totalorder %s444_s22, 2  ;;  %s206_s15 = sand.u32 1, %s432_s19  }
  0x6e   : > { %p660_p12 = scmp.ne.s32.totalorder %s656_s3, 0  ;;  %s207_s18 = scalar_lea.sflag [#allocation6], %s206_s15 }
  0x70   : > { %p296_p2 = pnand %p300_p11, %p660_p12 }
  0x72   : > { %427 = dma.done.wait (!%p296_p2), %s207_s18, 128  }
  0x73   : > { %429 = vsyncadd (!%p296_p2), %s207_s18, 4294967168  ;;  %p19_p4 = scmp.ge.s32.totalorder %s503_s24, 6   ;;  %s661_s19 = smov %s436_s20 }
  0x74   : > { %s662_s20 = smov %s440_s21  ;;  %s663_s21 = smov %s515_s27 }
  0x75   : > { %s664_s22 = smov %s503_s24  ;;  %21 = sbr.rel (!%p19_p4) target bundleno = 17 (0x11), region = 77 }
  0x7c   :  { %212 = vsyncpa [#allocation5], 1 }
  0x7d   :  { %214 = vsyncpa [#allocation5 + $0x1], 1 }
  0x7e   :  { %215 = vsyncpa [#allocation6], 1 }
  0x7f   :  { %217 = vsyncpa [#allocation6 + $0x1], 1 }

</bundles_post_ra>
